<compile_context>
chip_gen: v7x
topology: tpu7x:2x2x1
jax: 0.10.0
libtpu: 0.0.40
codegen_flags: <defaults>
</compile_context>

<pallas_src>
import functools

import jax
import jax.numpy as jnp
import numpy as np
from jax.experimental import pallas as pl
from jax.experimental.pallas import tpu as pltpu

LN_EPS = 1e-5


# --------------------------------------------------------------------------
# Pallas kernel: one (batch, q-tile) element per grid step.
# --------------------------------------------------------------------------
def _hca_kernel(
    xq_ref,      # (1, C, TQ)  query tokens, channel-major, bf16 (pos-embed added)
    k_ref,       # (1, nk, C)  key tokens, token-major, bf16 (pos-embed added, kH-pooled)
    v_ref,       # (1, C, nk)  value tokens, channel-major, bf16 (kH-pooled)
    w_ref,       # (4, C, C)   bf16 stacked weights [Wq*, Wk*^T, Wv*, Wo]
    b_ref,       # (C, 2)      f32: [:,0] query bias (pre-scaled), [:,1] output bias
    rep_k_ref,   # (H*nk, nk)  bf16 0/1 sublane replication selector for K
    mask_k_ref,  # (H*nk, C)   f32  0/1 per-head channel mask for K
    rep_v_ref,   # (nk, H*nk)  bf16 0/1 lane replication selector for V
    mask_v_ref,  # (C, H*nk)   f32  0/1 per-head channel mask for V
    out_ref,     # (1, C, TQ)  f32
    *, num_heads, nk):
  f32 = jnp.float32
  bf16 = jnp.bfloat16

  xqT = xq_ref[0].astype(f32)       # (C, TQ)
  k_tok = k_ref[0].astype(f32)      # (nk, C)
  vT = v_ref[0].astype(f32)         # (C, nk)

  # LayerNorm statistics in f32; gamma/beta are folded into the projection
  # weights on the host, so only normalization happens here.
  def norm_cols(x):   # normalize over the channel (sublane) axis of (C, n)
    mu = jnp.mean(x, axis=0, keepdims=True)
    var = jnp.mean(jnp.square(x - mu), axis=0, keepdims=True)
    return (x - mu) * jax.lax.rsqrt(var + LN_EPS)

  def norm_rows(x):   # normalize over the channel (lane) axis of (n, C)
    mu = jnp.mean(x, axis=-1, keepdims=True)
    var = jnp.mean(jnp.square(x - mu), axis=-1, keepdims=True)
    return (x - mu) * jax.lax.rsqrt(var + LN_EPS)

  qhat = norm_cols(xqT).astype(bf16)     # (C, TQ)
  khat = norm_rows(k_tok).astype(bf16)   # (nk, C)
  vhat = norm_cols(vT).astype(bf16)      # (C, nk)

  wq, wkT, wv, wo = w_ref[0], w_ref[1], w_ref[2], w_ref[3]
  bq = b_ref[:, 0:1]     # (C, 1) query bias (already * head_dim**-0.5)
  bo = b_ref[:, 1:2]     # (C, 1) output bias (value bias folded in)

  # Projections: bf16 x bf16 -> f32 accumulation on the MXU.  No transposes.
  qT = jnp.dot(wq, qhat, preferred_element_type=f32) + bq    # (C, TQ)
  k_p = jnp.dot(khat, wkT, preferred_element_type=f32)       # (nk, C) key bias cancels in softmax
  v_p = jnp.dot(wv, vhat, preferred_element_type=f32)        # (C, nk) value bias folded into bo

  # ---- all-head logits in ONE MXU matmul ----------------------------------
  # kbd (H*nk, C): row block h holds the projected keys masked to head h's
  # channel slice.  Replication via precomputed 0/1 selector matmul (no
  # sublane concatenate), masking via a precomputed constant.
  kbd = (jnp.dot(rep_k_ref[...], k_p.astype(bf16), preferred_element_type=f32)
         * mask_k_ref[...]).astype(bf16)                               # (H*nk, C)
  logitsT = jnp.dot(kbd, qT.astype(bf16), preferred_element_type=f32)  # (H*nk, TQ)

  # ---- per-head softmax over the key (sublane) axis ------------------------
  p_blocks = []
  for h in range(num_heads):
    blk = logitsT[h * nk:(h + 1) * nk, :]                    # static, tile-aligned slice
    m = jnp.max(blk, axis=0, keepdims=True)
    e = jnp.exp(blk - m)
    s = jnp.sum(e, axis=0, keepdims=True)
    p_blocks.append(e * pl.reciprocal(s, approx=True))       # EUP reciprocal (free slot)
  pT = jnp.concatenate(p_blocks, axis=0).astype(bf16)        # (H*nk, TQ)

  # ---- all-head P @ V in ONE MXU matmul -------------------------------------
  vbd = (jnp.dot(v_p.astype(bf16), rep_v_ref[...], preferred_element_type=f32)
         * mask_v_ref[...]).astype(bf16)                     # (C, H*nk)
  outT = jnp.dot(vbd, pT, preferred_element_type=f32)        # (C, TQ)

  # output projection + residual (dropout / DropPath are identity at inference)
  projT = jnp.dot(wo, outT.astype(bf16), preferred_element_type=f32) + bo
  out_ref[0] = xqT + projT
  # TODO(synk): at production C/nq, regroup heads / fuse q tiles so the MXU
  # M,N dims reach >=256 (block-diagonal K inflates the contraction dim to C).


# --------------------------------------------------------------------------
# One-time host-side parameter folding (call once, reuse every forward).
# --------------------------------------------------------------------------
def prepare_params(raw, num_heads):
  """Folds LN gamma/beta into the projection weights/biases, folds the
  attention scale into Wq/bq, drops the key bias (softmax shift invariance),
  folds the value bias into the output bias, and pre-transposes Wk."""
  C = raw["wq"].shape[0]
  scale = (C // num_heads) ** -0.5
  wq_eff = raw["wq"] * raw["gq"][None, :] * scale
  bq_eff = (raw["wq"] @ raw["bq"] + raw["bql"]) * scale
  wkT_eff = (raw["wk"] * raw["gk"][None, :]).T
  wv_eff = raw["wv"] * raw["gv"][None, :]
  bv_eff = raw["wv"] @ raw["bv"] + raw["bvl"]
  bo_eff = raw["wo"] @ bv_eff + raw["bol"]
  return {
      "w_stack": jnp.stack([wq_eff, wkT_eff, wv_eff, raw["wo"]]).astype(jnp.bfloat16),
      "bias2": jnp.stack([bq_eff, bo_eff], axis=1).astype(jnp.float32),   # (C, 2)
  }


def _head_constants(C, num_heads, nk):
  """0/1 replication selectors and per-head channel masks (trace-time consts)."""
  hd = C // num_heads
  hnk = num_heads * nk
  r = np.arange(hnk)
  rep_k = (r[:, None] % nk == np.arange(nk)[None, :]).astype(np.float32)             # (H*nk, nk)
  mask_k = ((r[:, None] // nk) == (np.arange(C)[None, :] // hd)).astype(np.float32)  # (H*nk, C)
  return (jnp.asarray(rep_k, jnp.bfloat16), jnp.asarray(mask_k, jnp.float32),
          jnp.asarray(rep_k.T, jnp.bfloat16), jnp.asarray(mask_k.T, jnp.float32))


# --------------------------------------------------------------------------
# Wrapper
# --------------------------------------------------------------------------
def horizontal_cross_attn(query, key, value, query_pos_embed, key_pos_embed,
                          kparams, num_heads, *, q_tile=128, reshape_back=True):
  B, C, qH, qW = query.shape
  _, N, _, kH, kW = key.shape
  nq = qH * qW
  nk = N * kW
  assert C % num_heads == 0

  xq = query + query_pos_embed if query_pos_embed is not None else query
  xk = key + key_pos_embed if key_pos_embed is not None else key

  # 'mean' pool over kH in XLA so the kernel DMAs kH-times less K/V data.
  kpool = jnp.mean(xk, axis=3)       # (B, N, C, kW)
  vpool = jnp.mean(value, axis=3)    # (B, N, C, kW)

  # Channel-major q/v/out (NCHW in/out are pure reshapes); bf16 activations
  # halve HBM->VMEM bytes, all accumulation stays f32 in-kernel.
  xqT = xq.reshape(B, C, nq).astype(jnp.bfloat16)                             # (B, C, nq)
  k_tok = kpool.transpose(0, 1, 3, 2).reshape(B, nk, C).astype(jnp.bfloat16)  # (B, nk, C)
  vT = vpool.transpose(0, 2, 1, 3).reshape(B, C, nk).astype(jnp.bfloat16)     # (B, C, nk)

  rep_k, mask_k, rep_v, mask_v = _head_constants(C, num_heads, nk)

  # Lane-dense q/out tiles (multiple of 128 whenever nq allows it).
  tq = q_tile if nq % q_tile == 0 else nq
  nqt = nq // tq
  hnk = num_heads * nk

  const2 = lambda shape: pl.BlockSpec(shape, lambda b, qi: (0, 0))
  in_specs = [
      pl.BlockSpec((1, C, tq), lambda b, qi: (b, 0, qi)),    # query tile
      pl.BlockSpec((1, nk, C), lambda b, qi: (b, 0, 0)),     # keys   (fetched once per batch)
      pl.BlockSpec((1, C, nk), lambda b, qi: (b, 0, 0)),     # values (fetched once per batch)
      pl.BlockSpec((4, C, C), lambda b, qi: (0, 0, 0)),      # stacked projection weights
      const2((C, 2)),                                        # stacked biases
      const2((hnk, nk)), const2((hnk, C)),                   # rep_k, mask_k
      const2((nk, hnk)), const2((C, hnk)),                   # rep_v, mask_v
  ]
  # TODO(synk): on v7x at production sizes, mark the constant-index blocks
  # pipeline_mode=pl.Buffered(1) (or stage them in scratch) to halve their
  # resident VMEM, and re-derive tq for the 64 MiB budget.

  out = pl.pallas_call(
      functools.partial(_hca_kernel, num_heads=num_heads, nk=nk),
      out_shape=jax.ShapeDtypeStruct((B, C, nq), jnp.float32),
      grid_spec=pltpu.PrefetchScalarGridSpec(
          num_scalar_prefetch=0,
          grid=(B, nqt),            # q-tile axis innermost: K/V re-DMA only when b changes
          in_specs=in_specs,
          out_specs=pl.BlockSpec((1, C, tq), lambda b, qi: (b, 0, qi)),
      ),
      compiler_params=pltpu.CompilerParams(
          dimension_semantics=("parallel", "parallel"),   # megacore-friendly even at B=1
          vmem_limit_bytes=48 * 1024 * 1024),
  )(xqT, k_tok, vT, kparams["w_stack"], kparams["bias2"],
    rep_k, mask_k, rep_v, mask_v)

  if reshape_back:
    return out.reshape(B, C, qH, qW)      # channel-major output == NCHW reshape
  return out.transpose(0, 2, 1)           # (B, nq, C) token-major


# --------------------------------------------------------------------------
# Pure-JAX f32 reference (mirrors the PyTorch forward at inference time)
# --------------------------------------------------------------------------
def reference_forward(query, key, value, qpe, kpe, params, num_heads,
                      reshape_back=True):
  xq = query + qpe if qpe is not None else query
  xk = key + kpe if kpe is not None else key
  B, C, qH, qW = xq.shape
  _, N, _, kH, kW = xk.shape

  kpool = xk.mean(axis=3)      # (B, N, C, kW)
  vpool = value.mean(axis=3)   # (B, N, C, kW)

  xq_tok = xq.reshape(B, C, qH * qW).transpose(0, 2, 1)
  k_tok = kpool.transpose(0, 1, 3, 2).reshape(B, N * kW, C)
  v_tok = vpool.transpose(0, 1, 3, 2).reshape(B, N * kW, C)

  def ln(x, g, b):
    mu = x.mean(-1, keepdims=True)
    var = ((x - mu) ** 2).mean(-1, keepdims=True)
    return (x - mu) / jnp.sqrt(var + LN_EPS) * g + b

  qn = ln(xq_tok, params["gq"], params["bq"])
  kn = ln(k_tok, params["gk"], params["bk"])
  vn = ln(v_tok, params["gv"], params["bv"])

  q = qn @ params["wq"].T + params["bql"]
  k = kn @ params["wk"].T + params["bkl"]
  v = vn @ params["wv"].T + params["bvl"]

  hd = C // num_heads
  q = q.reshape(B, -1, num_heads, hd).transpose(0, 2, 1, 3)
  k = k.reshape(B, -1, num_heads, hd).transpose(0, 2, 1, 3)
  v = v.reshape(B, -1, num_heads, hd).transpose(0, 2, 1, 3)

  attn = jnp.einsum("bhqd,bhkd->bhqk", q, k) * hd ** (-0.5)
  attn = jax.nn.softmax(attn, axis=-1)
  o = jnp.einsum("bhqk,bhkd->bhqd", attn, v)
  o = o.transpose(0, 2, 1, 3).reshape(B, -1, C)
  o = o @ params["wo"].T + params["bol"]

  out = xq_tok + o
  if reshape_back:
    out = out.transpose(0, 2, 1).reshape(B, C, qH, qW)
  return out


# --------------------------------------------------------------------------
# Main
# --------------------------------------------------------------------------
if __name__ == "__main__":
  B, C, qH, qW = 2, 32, 8, 16         # embed_dims = 32, nq = 128 (lane-dense tile)
  N, kH, kW = 2, 4, 8                 # multi-view key/value, nk = 16 after kH pooling
  num_heads = 4

  root = jax.random.PRNGKey(0)
  ks = jax.random.split(root, 20)

  query = jax.random.normal(ks[0], (B, C, qH, qW), jnp.float32)
  key = jax.random.normal(ks[1], (B, N, C, kH, kW), jnp.float32)
  value = jax.random.normal(ks[2], (B, N, C, kH, kW), jnp.float32)
  qpe = 0.1 * jax.random.normal(ks[3], (B, C, qH, qW), jnp.float32)
  kpe = 0.1 * jax.random.normal(ks[4], (B, N, C, kH, kW), jnp.float32)

  raw_params = {
      # LayerNorm params (canonical (C,) vectors)
      "gq": 1.0 + 0.1 * jax.random.normal(ks[5], (C,), jnp.float32),
      "bq": 0.1 * jax.random.normal(ks[6], (C,), jnp.float32),
      "gk": 1.0 + 0.1 * jax.random.normal(ks[7], (C,), jnp.float32),
      "bk": 0.1 * jax.random.normal(ks[8], (C,), jnp.float32),
      "gv": 1.0 + 0.1 * jax.random.normal(ks[9], (C,), jnp.float32),
      "bv": 0.1 * jax.random.normal(ks[10], (C,), jnp.float32),
      # attention linear layers, PyTorch (out,in) orientation, qkv_bias
      "wq": 0.1 * jax.random.normal(ks[11], (C, C), jnp.float32),
      "bql": 0.1 * jax.random.normal(ks[12], (C,), jnp.float32),
      "wk": 0.1 * jax.random.normal(ks[13], (C, C), jnp.float32),
      "bkl": 0.1 * jax.random.normal(ks[14], (C,), jnp.float32),
      "wv": 0.1 * jax.random.normal(ks[15], (C, C), jnp.float32),
      "bvl": 0.1 * jax.random.normal(ks[16], (C,), jnp.float32),
      "wo": 0.1 * jax.random.normal(ks[17], (C, C), jnp.float32),
      "bol": 0.1 * jax.random.normal(ks[18], (C,), jnp.float32),
  }
  # TODO(synk): BEVFeatureGenerateModule's optional FFN/ffn_norm branch
  # (ffn_cfg is not None) and the self-attn layer variant are not implemented
  # here; ffn_dim=0 / inference config -> dropout, DropPath and torch
  # checkpoint (with_cp) are identity / no-ops.

  kernel_params = prepare_params(raw_params, num_heads)   # one-time host folding

  out = horizontal_cross_attn(query, key, value, qpe, kpe, kernel_params,
                              num_heads=num_heads, reshape_back=True)
  out = jax.block_until_ready(out)

  ref = reference_forward(query, key, value, qpe, kpe, raw_params,
                          num_heads=num_heads, reshape_back=True)
  ref = jax.block_until_ready(ref)

  # bf16 activations/weights (f32 accumulation) + approx softmax reciprocal vs
  # a pure-f32 reference: ~1e-2 tolerance is the expected mixed-precision gap.
  np.testing.assert_allclose(np.asarray(out), np.asarray(ref),
                             rtol=2e-2, atol=2e-2)
  print("KERNEL_OK")
</pallas_src>

<mosaic_0001>
module attributes {stable_mosaic.version = 11 : i64} {
  func.func @_hca_kernel(%arg0: i32, %arg1: i32, %arg2: memref<1x32x128xbf16, #tpu.memory_space<vmem>>, %arg3: memref<1x16x32xbf16, #tpu.memory_space<vmem>>, %arg4: memref<1x32x16xbf16, #tpu.memory_space<vmem>>, %arg5: memref<4x32x32xbf16, #tpu.memory_space<vmem>>, %arg6: memref<32x2xf32, #tpu.memory_space<vmem>>, %arg7: memref<64x16xbf16, #tpu.memory_space<vmem>>, %arg8: memref<64x32xf32, #tpu.memory_space<vmem>>, %arg9: memref<16x64xbf16, #tpu.memory_space<vmem>>, %arg10: memref<32x64xf32, #tpu.memory_space<vmem>>, %arg11: memref<1x32x128xf32, #tpu.memory_space<vmem>>) attributes {dimension_semantics = [#tpu.dimension_semantics<parallel>, #tpu.dimension_semantics<parallel>], iteration_bounds = array<i64: 2, 1>, scalar_prefetch = 0 : i64, scratch_operands = 0 : i64, tpu.core_type = #tpu.core_type<tc>, window_params = [{transform_indices = @transform_0, window_bounds = array<i64: 1, 32, 128>}, {transform_indices = @transform_1, window_bounds = array<i64: 1, 16, 32>}, {transform_indices = @transform_2, window_bounds = array<i64: 1, 32, 16>}, {pipeline_mode = #tpu.pipeline_mode<synchronous>, transform_indices = @transform_3, window_bounds = array<i64: 4, 32, 32>}, {pipeline_mode = #tpu.pipeline_mode<synchronous>, transform_indices = @transform_4, window_bounds = array<i64: 32, 2>}, {pipeline_mode = #tpu.pipeline_mode<synchronous>, transform_indices = @transform_5, window_bounds = array<i64: 64, 16>}, {pipeline_mode = #tpu.pipeline_mode<synchronous>, transform_indices = @transform_6, window_bounds = array<i64: 64, 32>}, {pipeline_mode = #tpu.pipeline_mode<synchronous>, transform_indices = @transform_7, window_bounds = array<i64: 16, 64>}, {pipeline_mode = #tpu.pipeline_mode<synchronous>, transform_indices = @transform_8, window_bounds = array<i64: 32, 64>}, {transform_indices = @transform_9, window_bounds = array<i64: 1, 32, 128>}]} {
    %c0 = arith.constant 0 : index
    %c0_0 = arith.constant 0 : index
    %c0_1 = arith.constant 0 : index
    %0 = vector.load %arg2[%c0, %c0_0, %c0_1] : memref<1x32x128xbf16, #tpu.memory_space<vmem>>, vector<1x32x128xbf16>
    %1 = vector.shape_cast %0 : vector<1x32x128xbf16> to vector<32x128xbf16>
    %2 = arith.extf %1 : vector<32x128xbf16> to vector<32x128xf32>
    %c0_2 = arith.constant 0 : index
    %c0_3 = arith.constant 0 : index
    %c0_4 = arith.constant 0 : index
    %3 = vector.load %arg3[%c0_2, %c0_3, %c0_4] : memref<1x16x32xbf16, #tpu.memory_space<vmem>>, vector<1x16x32xbf16>
    %4 = vector.shape_cast %3 : vector<1x16x32xbf16> to vector<16x32xbf16>
    %5 = arith.extf %4 : vector<16x32xbf16> to vector<16x32xf32>
    %c0_5 = arith.constant 0 : index
    %c0_6 = arith.constant 0 : index
    %c0_7 = arith.constant 0 : index
    %6 = vector.load %arg4[%c0_5, %c0_6, %c0_7] : memref<1x32x16xbf16, #tpu.memory_space<vmem>>, vector<1x32x16xbf16>
    %7 = vector.shape_cast %6 : vector<1x32x16xbf16> to vector<32x16xbf16>
    %8 = arith.extf %7 : vector<32x16xbf16> to vector<32x16xf32>
    %cst = arith.constant dense<0.000000e+00> : vector<128xf32>
    %9 = vector.multi_reduction <add>, %2, %cst [0] : vector<32x128xf32> to vector<128xf32>
    %10 = vector.shape_cast %9 : vector<128xf32> to vector<1x128xf32>
    %cst_8 = arith.constant 3.200000e+01 : f32
    %11 = vector.broadcast %cst_8 : f32 to vector<1x128xf32>
    %12 = arith.divf %10, %11 : vector<1x128xf32>
    %13 = vector.broadcast %12 : vector<1x128xf32> to vector<32x128xf32>
    %14 = arith.subf %2, %13 : vector<32x128xf32>
    %15 = arith.mulf %14, %14 : vector<32x128xf32>
    %cst_9 = arith.constant dense<0.000000e+00> : vector<128xf32>
    %16 = vector.multi_reduction <add>, %15, %cst_9 [0] : vector<32x128xf32> to vector<128xf32>
    %17 = vector.shape_cast %16 : vector<128xf32> to vector<1x128xf32>
    %cst_10 = arith.constant 3.200000e+01 : f32
    %18 = vector.broadcast %cst_10 : f32 to vector<1x128xf32>
    %19 = arith.divf %17, %18 : vector<1x128xf32>
    %20 = vector.broadcast %12 : vector<1x128xf32> to vector<32x128xf32>
    %21 = arith.subf %2, %20 : vector<32x128xf32>
    %cst_11 = arith.constant 9.99999974E-6 : f32
    %22 = vector.broadcast %cst_11 : f32 to vector<1x128xf32>
    %23 = arith.addf %19, %22 : vector<1x128xf32>
    %24 = math.rsqrt %23 : vector<1x128xf32>
    %25 = vector.broadcast %24 : vector<1x128xf32> to vector<32x128xf32>
    %26 = arith.mulf %21, %25 : vector<32x128xf32>
    %27 = arith.truncf %26 : vector<32x128xf32> to vector<32x128xbf16>
    %cst_12 = arith.constant dense<0.000000e+00> : vector<16xf32>
    %28 = vector.multi_reduction <add>, %5, %cst_12 [1] : vector<16x32xf32> to vector<16xf32>
    %29 = vector.shape_cast %28 : vector<16xf32> to vector<16x1xf32>
    %cst_13 = arith.constant 3.200000e+01 : f32
    %30 = vector.broadcast %cst_13 : f32 to vector<16x1xf32>
    %31 = arith.divf %29, %30 : vector<16x1xf32>
    %32 = vector.broadcast %31 : vector<16x1xf32> to vector<16x32xf32>
    %33 = arith.subf %5, %32 : vector<16x32xf32>
    %34 = arith.mulf %33, %33 : vector<16x32xf32>
    %cst_14 = arith.constant dense<0.000000e+00> : vector<16xf32>
    %35 = vector.multi_reduction <add>, %34, %cst_14 [1] : vector<16x32xf32> to vector<16xf32>
    %36 = vector.shape_cast %35 : vector<16xf32> to vector<16x1xf32>
    %cst_15 = arith.constant 3.200000e+01 : f32
    %37 = vector.broadcast %cst_15 : f32 to vector<16x1xf32>
    %38 = arith.divf %36, %37 : vector<16x1xf32>
    %39 = vector.broadcast %31 : vector<16x1xf32> to vector<16x32xf32>
    %40 = arith.subf %5, %39 : vector<16x32xf32>
    %cst_16 = arith.constant 9.99999974E-6 : f32
    %41 = vector.broadcast %cst_16 : f32 to vector<16x1xf32>
    %42 = arith.addf %38, %41 : vector<16x1xf32>
    %43 = math.rsqrt %42 : vector<16x1xf32>
    %44 = vector.broadcast %43 : vector<16x1xf32> to vector<16x32xf32>
    %45 = arith.mulf %40, %44 : vector<16x32xf32>
    %46 = arith.truncf %45 : vector<16x32xf32> to vector<16x32xbf16>
    %cst_17 = arith.constant dense<0.000000e+00> : vector<16xf32>
    %47 = vector.multi_reduction <add>, %8, %cst_17 [0] : vector<32x16xf32> to vector<16xf32>
    %48 = vector.shape_cast %47 : vector<16xf32> to vector<1x16xf32>
    %cst_18 = arith.constant 3.200000e+01 : f32
    %49 = vector.broadcast %cst_18 : f32 to vector<1x16xf32>
    %50 = arith.divf %48, %49 : vector<1x16xf32>
    %51 = vector.broadcast %50 : vector<1x16xf32> to vector<32x16xf32>
    %52 = arith.subf %8, %51 : vector<32x16xf32>
    %53 = arith.mulf %52, %52 : vector<32x16xf32>
    %cst_19 = arith.constant dense<0.000000e+00> : vector<16xf32>
    %54 = vector.multi_reduction <add>, %53, %cst_19 [0] : vector<32x16xf32> to vector<16xf32>
    %55 = vector.shape_cast %54 : vector<16xf32> to vector<1x16xf32>
    %cst_20 = arith.constant 3.200000e+01 : f32
    %56 = vector.broadcast %cst_20 : f32 to vector<1x16xf32>
    %57 = arith.divf %55, %56 : vector<1x16xf32>
    %58 = vector.broadcast %50 : vector<1x16xf32> to vector<32x16xf32>
    %59 = arith.subf %8, %58 : vector<32x16xf32>
    %cst_21 = arith.constant 9.99999974E-6 : f32
    %60 = vector.broadcast %cst_21 : f32 to vector<1x16xf32>
    %61 = arith.addf %57, %60 : vector<1x16xf32>
    %62 = math.rsqrt %61 : vector<1x16xf32>
    %63 = vector.broadcast %62 : vector<1x16xf32> to vector<32x16xf32>
    %64 = arith.mulf %59, %63 : vector<32x16xf32>
    %65 = arith.truncf %64 : vector<32x16xf32> to vector<32x16xbf16>
    %c0_22 = arith.constant 0 : index
    %c0_23 = arith.constant 0 : index
    %c0_24 = arith.constant 0 : index
    %66 = vector.load %arg5[%c0_22, %c0_23, %c0_24] : memref<4x32x32xbf16, #tpu.memory_space<vmem>>, vector<1x32x32xbf16>
    %67 = vector.shape_cast %66 : vector<1x32x32xbf16> to vector<32x32xbf16>
    %c1 = arith.constant 1 : index
    %c0_25 = arith.constant 0 : index
    %c0_26 = arith.constant 0 : index
    %68 = vector.load %arg5[%c1, %c0_25, %c0_26] : memref<4x32x32xbf16, #tpu.memory_space<vmem>>, vector<1x32x32xbf16>
    %69 = vector.shape_cast %68 : vector<1x32x32xbf16> to vector<32x32xbf16>
    %c2 = arith.constant 2 : index
    %c0_27 = arith.constant 0 : index
    %c0_28 = arith.constant 0 : index
    %70 = vector.load %arg5[%c2, %c0_27, %c0_28] : memref<4x32x32xbf16, #tpu.memory_space<vmem>>, vector<1x32x32xbf16>
    %71 = vector.shape_cast %70 : vector<1x32x32xbf16> to vector<32x32xbf16>
    %c3 = arith.constant 3 : index
    %c0_29 = arith.constant 0 : index
    %c0_30 = arith.constant 0 : index
    %72 = vector.load %arg5[%c3, %c0_29, %c0_30] : memref<4x32x32xbf16, #tpu.memory_space<vmem>>, vector<1x32x32xbf16>
    %73 = vector.shape_cast %72 : vector<1x32x32xbf16> to vector<32x32xbf16>
    %c0_31 = arith.constant 0 : index
    %c0_32 = arith.constant 0 : index
    %74 = vector.load %arg6[%c0_31, %c0_32] : memref<32x2xf32, #tpu.memory_space<vmem>>, vector<32x1xf32>
    %c0_33 = arith.constant 0 : index
    %c1_34 = arith.constant 1 : index
    %75 = vector.load %arg6[%c0_33, %c1_34] : memref<32x2xf32, #tpu.memory_space<vmem>>, vector<32x1xf32>
    %cst_35 = arith.constant dense<0.000000e+00> : vector<32x128xf32>
    %76 = tpu.matmul %67, %27, %cst_35 {dimension_numbers = #tpu.dot_dimension_numbers<[1], [0], [0], [1], [0, 0, 1, 1], [], []>} : vector<32x32xbf16>, vector<32x128xbf16>, vector<32x128xf32> -> vector<32x128xf32>
    %77 = vector.broadcast %74 : vector<32x1xf32> to vector<32x128xf32>
    %78 = arith.addf %76, %77 : vector<32x128xf32>
    %cst_36 = arith.constant dense<0.000000e+00> : vector<16x32xf32>
    %79 = tpu.matmul %46, %69, %cst_36 {dimension_numbers = #tpu.dot_dimension_numbers<[1], [0], [0], [1], [0, 0, 1, 1], [], []>} : vector<16x32xbf16>, vector<32x32xbf16>, vector<16x32xf32> -> vector<16x32xf32>
    %cst_37 = arith.constant dense<0.000000e+00> : vector<32x16xf32>
    %80 = tpu.matmul %71, %65, %cst_37 {dimension_numbers = #tpu.dot_dimension_numbers<[1], [0], [0], [1], [0, 0, 1, 1], [], []>} : vector<32x32xbf16>, vector<32x16xbf16>, vector<32x16xf32> -> vector<32x16xf32>
    %c0_38 = arith.constant 0 : index
    %c0_39 = arith.constant 0 : index
    %81 = vector.load %arg7[%c0_38, %c0_39] : memref<64x16xbf16, #tpu.memory_space<vmem>>, vector<64x16xbf16>
    %82 = arith.truncf %79 : vector<16x32xf32> to vector<16x32xbf16>
    %cst_40 = arith.constant dense<0.000000e+00> : vector<64x32xf32>
    %83 = tpu.matmul %81, %82, %cst_40 {dimension_numbers = #tpu.dot_dimension_numbers<[1], [0], [0], [1], [0, 0, 1, 1], [], []>} : vector<64x16xbf16>, vector<16x32xbf16>, vector<64x32xf32> -> vector<64x32xf32>
    %c0_41 = arith.constant 0 : index
    %c0_42 = arith.constant 0 : index
    %84 = vector.load %arg8[%c0_41, %c0_42] : memref<64x32xf32, #tpu.memory_space<vmem>>, vector<64x32xf32>
    %85 = arith.mulf %83, %84 : vector<64x32xf32>
    %86 = arith.truncf %85 : vector<64x32xf32> to vector<64x32xbf16>
    %87 = arith.truncf %78 : vector<32x128xf32> to vector<32x128xbf16>
    %cst_43 = arith.constant dense<0.000000e+00> : vector<64x128xf32>
    %88 = tpu.matmul %86, %87, %cst_43 {dimension_numbers = #tpu.dot_dimension_numbers<[1], [0], [0], [1], [0, 0, 1, 1], [], []>} : vector<64x32xbf16>, vector<32x128xbf16>, vector<64x128xf32> -> vector<64x128xf32>
    %89 = vector.extract_strided_slice %88 {offsets = [0, 0], sizes = [16, 128], strides = [1, 1]} : vector<64x128xf32> to vector<16x128xf32>
    %cst_44 = arith.constant dense<0xFF800000> : vector<128xf32>
    %90 = vector.multi_reduction <maximumf>, %89, %cst_44 [0] : vector<16x128xf32> to vector<128xf32>
    %91 = vector.shape_cast %90 : vector<128xf32> to vector<1x128xf32>
    %92 = vector.broadcast %91 : vector<1x128xf32> to vector<16x128xf32>
    %93 = arith.subf %89, %92 : vector<16x128xf32>
    %94 = math.exp %93 : vector<16x128xf32>
    %cst_45 = arith.constant dense<0.000000e+00> : vector<128xf32>
    %95 = vector.multi_reduction <add>, %94, %cst_45 [0] : vector<16x128xf32> to vector<128xf32>
    %96 = vector.shape_cast %95 : vector<128xf32> to vector<1x128xf32>
    %97 = tpu.reciprocal %96 {approx = true} : vector<1x128xf32> -> vector<1x128xf32>
    %98 = vector.broadcast %97 : vector<1x128xf32> to vector<16x128xf32>
    %99 = arith.mulf %94, %98 : vector<16x128xf32>
    %100 = vector.extract_strided_slice %88 {offsets = [16, 0], sizes = [16, 128], strides = [1, 1]} : vector<64x128xf32> to vector<16x128xf32>
    %cst_46 = arith.constant dense<0xFF800000> : vector<128xf32>
    %101 = vector.multi_reduction <maximumf>, %100, %cst_46 [0] : vector<16x128xf32> to vector<128xf32>
    %102 = vector.shape_cast %101 : vector<128xf32> to vector<1x128xf32>
    %103 = vector.broadcast %102 : vector<1x128xf32> to vector<16x128xf32>
    %104 = arith.subf %100, %103 : vector<16x128xf32>
    %105 = math.exp %104 : vector<16x128xf32>
    %cst_47 = arith.constant dense<0.000000e+00> : vector<128xf32>
    %106 = vector.multi_reduction <add>, %105, %cst_47 [0] : vector<16x128xf32> to vector<128xf32>
    %107 = vector.shape_cast %106 : vector<128xf32> to vector<1x128xf32>
    %108 = tpu.reciprocal %107 {approx = true} : vector<1x128xf32> -> vector<1x128xf32>
    %109 = vector.broadcast %108 : vector<1x128xf32> to vector<16x128xf32>
    %110 = arith.mulf %105, %109 : vector<16x128xf32>
    %111 = vector.extract_strided_slice %88 {offsets = [32, 0], sizes = [16, 128], strides = [1, 1]} : vector<64x128xf32> to vector<16x128xf32>
    %cst_48 = arith.constant dense<0xFF800000> : vector<128xf32>
    %112 = vector.multi_reduction <maximumf>, %111, %cst_48 [0] : vector<16x128xf32> to vector<128xf32>
    %113 = vector.shape_cast %112 : vector<128xf32> to vector<1x128xf32>
    %114 = vector.broadcast %113 : vector<1x128xf32> to vector<16x128xf32>
    %115 = arith.subf %111, %114 : vector<16x128xf32>
    %116 = math.exp %115 : vector<16x128xf32>
    %cst_49 = arith.constant dense<0.000000e+00> : vector<128xf32>
    %117 = vector.multi_reduction <add>, %116, %cst_49 [0] : vector<16x128xf32> to vector<128xf32>
    %118 = vector.shape_cast %117 : vector<128xf32> to vector<1x128xf32>
    %119 = tpu.reciprocal %118 {approx = true} : vector<1x128xf32> -> vector<1x128xf32>
    %120 = vector.broadcast %119 : vector<1x128xf32> to vector<16x128xf32>
    %121 = arith.mulf %116, %120 : vector<16x128xf32>
    %122 = vector.extract_strided_slice %88 {offsets = [48, 0], sizes = [16, 128], strides = [1, 1]} : vector<64x128xf32> to vector<16x128xf32>
    %cst_50 = arith.constant dense<0xFF800000> : vector<128xf32>
    %123 = vector.multi_reduction <maximumf>, %122, %cst_50 [0] : vector<16x128xf32> to vector<128xf32>
    %124 = vector.shape_cast %123 : vector<128xf32> to vector<1x128xf32>
    %125 = vector.broadcast %124 : vector<1x128xf32> to vector<16x128xf32>
    %126 = arith.subf %122, %125 : vector<16x128xf32>
    %127 = math.exp %126 : vector<16x128xf32>
    %cst_51 = arith.constant dense<0.000000e+00> : vector<128xf32>
    %128 = vector.multi_reduction <add>, %127, %cst_51 [0] : vector<16x128xf32> to vector<128xf32>
    %129 = vector.shape_cast %128 : vector<128xf32> to vector<1x128xf32>
    %130 = tpu.reciprocal %129 {approx = true} : vector<1x128xf32> -> vector<1x128xf32>
    %131 = vector.broadcast %130 : vector<1x128xf32> to vector<16x128xf32>
    %132 = arith.mulf %127, %131 : vector<16x128xf32>
    %133 = tpu.concatenate %99, %110, %121, %132 in 0 : vector<16x128xf32>, vector<16x128xf32>, vector<16x128xf32>, vector<16x128xf32> -> vector<64x128xf32>
    %134 = arith.truncf %133 : vector<64x128xf32> to vector<64x128xbf16>
    %135 = arith.truncf %80 : vector<32x16xf32> to vector<32x16xbf16>
    %c0_52 = arith.constant 0 : index
    %c0_53 = arith.constant 0 : index
    %136 = vector.load %arg9[%c0_52, %c0_53] : memref<16x64xbf16, #tpu.memory_space<vmem>>, vector<16x64xbf16>
    %cst_54 = arith.constant dense<0.000000e+00> : vector<32x64xf32>
    %137 = tpu.matmul %135, %136, %cst_54 {dimension_numbers = #tpu.dot_dimension_numbers<[1], [0], [0], [1], [0, 0, 1, 1], [], []>} : vector<32x16xbf16>, vector<16x64xbf16>, vector<32x64xf32> -> vector<32x64xf32>
    %c0_55 = arith.constant 0 : index
    %c0_56 = arith.constant 0 : index
    %138 = vector.load %arg10[%c0_55, %c0_56] : memref<32x64xf32, #tpu.memory_space<vmem>>, vector<32x64xf32>
    %139 = arith.mulf %137, %138 : vector<32x64xf32>
    %140 = arith.truncf %139 : vector<32x64xf32> to vector<32x64xbf16>
    %cst_57 = arith.constant dense<0.000000e+00> : vector<32x128xf32>
    %141 = tpu.matmul %140, %134, %cst_57 {dimension_numbers = #tpu.dot_dimension_numbers<[1], [0], [0], [1], [0, 0, 1, 1], [], []>} : vector<32x64xbf16>, vector<64x128xbf16>, vector<32x128xf32> -> vector<32x128xf32>
    %142 = arith.truncf %141 : vector<32x128xf32> to vector<32x128xbf16>
    %cst_58 = arith.constant dense<0.000000e+00> : vector<32x128xf32>
    %143 = tpu.matmul %73, %142, %cst_58 {dimension_numbers = #tpu.dot_dimension_numbers<[1], [0], [0], [1], [0, 0, 1, 1], [], []>} : vector<32x32xbf16>, vector<32x128xbf16>, vector<32x128xf32> -> vector<32x128xf32>
    %144 = vector.broadcast %75 : vector<32x1xf32> to vector<32x128xf32>
    %145 = arith.addf %143, %144 : vector<32x128xf32>
    %146 = arith.addf %2, %145 : vector<32x128xf32>
    %c0_59 = arith.constant 0 : index
    %c0_60 = arith.constant 0 : index
    %c0_61 = arith.constant 0 : index
    %147 = vector.load %arg11[%c0_59, %c0_60, %c0_61] : memref<1x32x128xf32, #tpu.memory_space<vmem>>, vector<1x32x128xf32>
    %148 = vector.shape_cast %147 : vector<1x32x128xf32> to vector<32x128xf32>
    %149 = vector.shape_cast %146 : vector<32x128xf32> to vector<1x32x128xf32>
    tpu.vector_store %arg11[%c0_59, %c0_60, %c0_61], %149 {strides = array<i32>} : memref<1x32x128xf32, #tpu.memory_space<vmem>>, vector<1x32x128xf32>,
    return
  }
  func.func @transform_0(%arg0: i32, %arg1: i32) -> (i32, i32, i32) {
    %c0_i32 = arith.constant 0 : i32
    %c0_i32_0 = arith.constant 0 : i32
    return %arg0, %c0_i32, %arg1 : i32, i32, i32
  }
  func.func @transform_1(%arg0: i32, %arg1: i32) -> (i32, i32, i32) {
    %c0_i32 = arith.constant 0 : i32
    %c0_i32_0 = arith.constant 0 : i32
    %c0_i32_1 = arith.constant 0 : i32
    return %arg0, %c0_i32, %c0_i32_0 : i32, i32, i32
  }
  func.func @transform_2(%arg0: i32, %arg1: i32) -> (i32, i32, i32) {
    %c0_i32 = arith.constant 0 : i32
    %c0_i32_0 = arith.constant 0 : i32
    %c0_i32_1 = arith.constant 0 : i32
    return %arg0, %c0_i32, %c0_i32_0 : i32, i32, i32
  }
  func.func @transform_3(%arg0: i32, %arg1: i32) -> (i32, i32, i32) {
    %c0_i32 = arith.constant 0 : i32
    %c0_i32_0 = arith.constant 0 : i32
    %c0_i32_1 = arith.constant 0 : i32
    %c0_i32_2 = arith.constant 0 : i32
    return %c0_i32, %c0_i32_0, %c0_i32_1 : i32, i32, i32
  }
  func.func @transform_4(%arg0: i32, %arg1: i32) -> (i32, i32) {
    %c0_i32 = arith.constant 0 : i32
    %c0_i32_0 = arith.constant 0 : i32
    %c0_i32_1 = arith.constant 0 : i32
    return %c0_i32, %c0_i32_0 : i32, i32
  }
  func.func @transform_5(%arg0: i32, %arg1: i32) -> (i32, i32) {
    %c0_i32 = arith.constant 0 : i32
    %c0_i32_0 = arith.constant 0 : i32
    %c0_i32_1 = arith.constant 0 : i32
    return %c0_i32, %c0_i32_0 : i32, i32
  }
  func.func @transform_6(%arg0: i32, %arg1: i32) -> (i32, i32) {
    %c0_i32 = arith.constant 0 : i32
    %c0_i32_0 = arith.constant 0 : i32
    %c0_i32_1 = arith.constant 0 : i32
    return %c0_i32, %c0_i32_0 : i32, i32
  }
  func.func @transform_7(%arg0: i32, %arg1: i32) -> (i32, i32) {
    %c0_i32 = arith.constant 0 : i32
    %c0_i32_0 = arith.constant 0 : i32
    %c0_i32_1 = arith.constant 0 : i32
    return %c0_i32, %c0_i32_0 : i32, i32
  }
  func.func @transform_8(%arg0: i32, %arg1: i32) -> (i32, i32) {
    %c0_i32 = arith.constant 0 : i32
    %c0_i32_0 = arith.constant 0 : i32
    %c0_i32_1 = arith.constant 0 : i32
    return %c0_i32, %c0_i32_0 : i32, i32
  }
  func.func @transform_9(%arg0: i32, %arg1: i32) -> (i32, i32, i32) {
    %c0_i32 = arith.constant 0 : i32
    %c0_i32_0 = arith.constant 0 : i32
    return %arg0, %c0_i32, %arg1 : i32, i32, i32
  }
}

</mosaic_0001>

<bundles_post_ra>
// kernel: tpu_custom_call.1
= control target key start
LH: loop header
LB: loop body
LE: loop exit
PB: predicated region body
PF: predicated region fallthrough
CT: control target
= control target key end

     0   :  { %14 = vsyncpa [#allocation3], 0  ;;  %s2139_s0 = inlined_call_operand.vmem [shape: bf16[2,32,128], index: 0, kind: input, shape index: {}]   ;;  %s2140_s1 = inlined_call_operand.vmem [shape: bf16[2,16,32], index: 1, kind: input, shape index: {}]   ;;  %s2141_s2 = inlined_call_operand.vmem [shape: bf16[2,32,16], index: 2, kind: input, shape index: {}]   ;;  %s2142_s3 = inlined_call_operand.vmem [shape: bf16[4,32,32], index: 3, kind: input, shape index: {}]   ;;  %s2143_s4 = inlined_call_operand.vmem [shape: f32[32,2], index: 4, kind: input, shape index: {}]   ;;  %s2144_s5 = inlined_call_operand.vmem [shape: bf16[64,16], index: 5, kind: input, shape index: {}]   ;;  %s2145_s6 = inlined_call_operand.vmem [shape: f32[64,32], index: 6, kind: input, shape index: {}]   ;;  %s2146_s7 = inlined_call_operand.vmem [shape: bf16[16,64], index: 7, kind: input, shape index: {}]   ;;  %s2147_s8 = inlined_call_operand.vmem [shape: f32[32,64], index: 8, kind: input, shape index: {}]   ;;  %s2148_s9 = inlined_call_operand.hbm [shape: f32[2,32,128], index: 9, kind: output, shape index: {}]  }
   0x1   :  { %16 = vsyncpa [#allocation3 + $0x1], 0  ;;  %s1837_s30 = smov 0   ;;  %s1839_s10 = smov 0  }
   0x2   :  { %s1841_s11 = smov 0   ;;  %s1843_s12 = smov 0  }
   0x3   :  { %s1845_s13 = smov 0   ;;  %s1847_s14 = smov 0  }
   0x4 LB: > { %s1396_s15 = sadd.s32 4294967295, %s1778_s14   ;;  %s1397_s16 = sadd.s32 4294967294, %s1778_s14   ;;  %s1778_s14 = sphi %s1847_s14, %s22_s14   ;;  %s1774_s13 = sphi %s1845_s13, %s2155_s13   ;;  %s1770_s12 = sphi %s1843_s12, %s2154_s12   ;;  %s1766_s11 = sphi %s1841_s11, %s2153_s11   ;;  %s1762_s10 = sphi %s1839_s10, %s2152_s10   ;;  %s1758_s30 = sphi %s1837_s30, %s2151_s30  }
   0x5   : > { %s34_s17 = sadd.s32 1, %s1774_s13  ;;  %s249_s18 = sadd.s32 1, %s1766_s11 }
   0x6   : > { %p36_p0 = scmp.ge.s32.totalorder %s34_s17, 2  ;;  %p259_p1 = scmp.ne.s32.totalorder %s1766_s11, %s1762_s10 }
   0x7   : > { %p260_p2 = scmp.eq.s32.totalorder %s1396_s15, 1  ;;  %p265_p3 = scmp.ne.s32.totalorder %s1762_s10, %s1758_s30 }
   0x8   : > { %s2157_s17 = smov (%p36_p0, %s34_s17), 0  ;;  %p266_p5 = scmp.eq.s32.totalorder %s1397_s16, 1 }
   0x9   : > { %p1877_p4 = por %p260_p2, %p259_p1  ;;  %s244_s20 = ssub.s32 %s1774_s13, %s2157_s17 }
   0xa   : > { %p1400_p6 = scmp.ge.s32.totalorder %s1778_s14, 1  ;;  %p247_p7 = scmp.eq.s32.totalorder %s244_s20, 0 }
   0xb   : > { %p1884_p8 = por %p266_p5, %p265_p3  ;;  %p329_p9 = scmp.lt.s32.totalorder %s1778_s14, 3 }
   0xc   : > { %s1890_s22 = scalar_select %p247_p7, %s1766_s11, %s249_s18  }
   0xd   : > { %p330_p10 = pnand %p1400_p6, %p329_p9 }
   0xe   : > { %p378_p11 = scmp.lt.s32.totalorder (!%p330_p10), %s1770_s12, 1  ;;  %vm454_vm0 = vcmask (!%p330_p10), 261120   ;;  %v1655_v15 = vld [vmem:[%s2142_s3 + $0x10] sm:$0xff] (!%p330_p10)   ;;  %v1780_v16 = vmov (!%p330_p10), 0.0   ;;  %vm1781_vm1 = vmmov (!%p330_p10), 0   ;;  %v1656_v17 = vld [vmem:[%s2142_s3 + $0x18] sm:$0xff] (!%p330_p10)  }
   0xf   : > { %333 = sbr.rel (%p330_p10) target bundleno = 1534 (0x5fe), region = 56  ;;  %1526 = vmatprep.subr.bf16.mxu1 (!%p330_p10), %v1780_v16  ;;  %1530 = vmatprep.mubr.msk.bf16.mxu1 (!%p330_p10), %vm1781_vm1, %v1780_v16  ;;  %v1657_v23 = vld [vmem:[%s2142_s3] sm:$0xff] (!%p330_p10)   ;;  %v1658_v61 = vld [vmem:[%s2142_s3 + $0x8] sm:$0xff] (!%p330_p10)   ;;  %vm482_vm2 = vcmask (!%p330_p10), 130048   ;;  %vm1132_vm3 = vcmask (!%p330_p10), 523264   ;;  %s375_s28 = sand.u32 (!%p330_p10), 1, %s1762_s10  }
  0x10   : > { %1527 = vmatpush3.bf16.msra.mxu1 (!%p330_p10), %v1655_v15  ;;  %1522 = vmatprep.mubr.msk.bf16.mxu0 (!%p330_p10), %vm454_vm0, %v1657_v23  ;;  %s1401_s29 = sshll.u32 (!%p330_p10), %s375_s28, 5  ;;  %s1784_s26 = smov (!%p330_p10), [#allocation2]  }
  0x11   : > { %1528 = vmatprep.subr.bf16.mxu1 (!%p330_p10), %v1780_v16  ;;  %s377_s15 = scalar_lea.vmem (!%p330_p10), [#allocation2], %s1401_s29 }
  0x12   : > { %s1294_s16 = sshll.u32 (!%p330_p10), %s377_s15, 4  ;;  %s2084_s16 = int_to_ptr.vmem [resolvable:$true] %s1294_s16 }
  0x14   : > { %1529 = vmatpush3.bf16.msra.mxu1 (!%p330_p10), %v1656_v17 }
  0x16   : > { %s1894_s23 = scalar_select %p378_p11, %s1770_s12, 1 }
  0x18   : > { %s1458_s24 = sshll.u32 %s1894_s23, 3  ;;  %s1457_s18 = sshll.u32 %s1894_s23, 4 }
  0x19   : > { %s390_s27 = scalar_lea.vmem %s2140_s1, %s1458_s24  ;;  %s385_s25 = scalar_lea.vmem %s2139_s0, %s1457_s18 }
  0x1a   : > { %v1470_v0 = vld [vmem:[%s390_s27] sm:$0xff]   ;;  %v1481_v19 = vld [vmem:[%s385_s25 + $0x8] sm:$0xff]   ;;  %s395_s20 = scalar_lea.vmem %s2141_s2, %s1457_s18  ;;  %s2093_s18 = scalar_lea.sflag [#allocation3], %s375_s28 }
  0x1b   : > { %v1471_v1 = vunpack.c.l.bf16 %v1470_v0  ;;  %v1472_v2 = vunpack.c.h.bf16 %v1470_v0  ;;  %v1462_v18 = vld [vmem:[%s385_s25] sm:$0xff]   ;;  %v1924_v20 = vunpack.c.l.bf16 %v1481_v19  ;;  %v1933_v24 = vunpack.c.h.bf16 %v1481_v19  ;;  %s1700_s25 = scalar_lea.vmem %s2084_s16, 512  ;;  %s1704_s27 = sshll.u32 %s1784_s26, 4  ;;  %s1705_s27 = int_to_ptr.vmem [resolvable:$false] %s1704_s27 }
  0x1c   : > { %v1926_v21 = vunpack.c.l.bf16 %v1462_v18  ;;  %v1928_v22 = vunpack.c.h.bf16 %v1462_v18  ;;  %p1701_p12 = scmp.ne.s32.totalorder %s2084_s16, %s1700_s25  ;;  %s1706_s29 = scalar_lea.vmem %s1705_s27, 1024 }
  0x1d   : > { %v455_v3 = vsel %vm454_vm0, %v1471_v1, 0.0  ;;  %v458_v4 = vsel %vm454_vm0, %v1472_v2, 0.0  ;;  %p1707_p1 = scmp.lt.s32.totalorder %s2084_s16, %s1705_s27  ;;  %p1708_p2 = scmp.lt.s32.totalorder %s1706_s29, %s1700_s25 }
  0x1e   : > { %456 = vadd.xlane.f32.xlu0 %v455_v3  ;;  %v417_v25 = vadd.f32 %v1928_v22, %v1926_v21  ;;  %p1702_p13 = pnand %p1701_p12, %p1877_p4 }
  0x1f   : > { %p1709_p3 = por %p1708_p2, %p1707_p1 }
  0x20   : > { %v418_v26 = vadd.f32 %v1924_v20, %v417_v25  ;;  %v1659_v25 = vld [vmem:[%s2144_s5] sm:$0xff]   ;;  %p1703_p0 = pneg %p1702_p13 }
  0x22   : > { %459 = vadd.xlane.f32.xlu0 %v458_v4  ;;  %v419_v27 = vadd.f32 %v1933_v24, %v418_v26  ;;  %p1710_p5 = pnand %p1709_p3, %p1703_p0 }
  0x24   : > { %v420_v28 = vrot.slane %v419_v27, 4 }
  0x26   : > { %v421_v29 = vadd.f32 %v420_v28, %v419_v27 }
  0x28   : > { %v422_v30 = vrot.slane %v421_v29, 2 }
  0x2a   : > { %v423_v31 = vadd.f32 %v422_v30, %v421_v29 }
  0x2c   : > { %v424_v32 = vrot.slane %v423_v31, 1 }
  0x2e   : > { %v425_v33 = vadd.f32 %v424_v32, %v423_v31  ;;  %v1663_v32 = vld [vmem:[%s2142_s3 + $0x20] sm:$0xff]  }
  0x30   : > { %v427_v34 = vmul.f32 0.03125, %v425_v33  ;;  %v1970_v33 = vld [vmem:[%s2143_s4 + $0x8] sm:$0xff] }
  0x32   : > { %v428_v35 = vsub.f32 %v1926_v21, %v427_v34  ;;  %v429_v36 = vsub.f32 %v1928_v22, %v427_v34  ;;  %v430_v37 = vsub.f32 %v1924_v20, %v427_v34  ;;  %v431_v38 = vsub.f32 %v1933_v24, %v427_v34 }
  0x33   : > { %v1782_v34 = vmov 0  }
  0x34   : > { %v432_v39 = vmul.f32 %v428_v35, %v428_v35  ;;  %v433_v40 = vmul.f32 %v429_v36, %v429_v36  ;;  %v434_v41 = vmul.f32 %v430_v37, %v430_v37  ;;  %v435_v42 = vmul.f32 %v431_v38, %v431_v38  ;;  %1652 = vset.pattern.permute.xlu1 %v1782_v34 }
  0x35   : > { %1651 = vset.pattern.permute.xlu0 %v1782_v34  ;;  %v1665_v34 = vld [vmem:[%s2146_s7] sm:$0xff]  }
  0x36   : > { %v436_v43 = vadd.f32 %v433_v40, %v432_v39 }
  0x38   : > { %v437_v44 = vadd.f32 %v436_v43, %v434_v41  ;;  %v1989_v43 = vld [vmem:[%s2143_s4 + $0x18] sm:$0xff] }
  0x3a   : > { %v438_v45 = vadd.f32 %v437_v44, %v435_v42 }
  0x3c   : > { %v439_v46 = vrot.slane %v438_v45, 4 }
  0x3e   : > { %v440_v47 = vadd.f32 %v439_v46, %v438_v45 }
  0x40   : > { %v441_v48 = vrot.slane %v440_v47, 2 }
  0x42   : > { %v442_v49 = vadd.f32 %v441_v48, %v440_v47 }
  0x44   : > { %v443_v50 = vrot.slane %v442_v49, 1 }
  0x46   : > { %v444_v51 = vadd.f32 %v443_v50, %v442_v49 }
  0x48   : > { %v445_v52 = vmul.f32 0.03125, %v444_v51 }
  0x4a   : > { %v446_v53 = vadd.f32 1e-05, %v445_v52 }
  0x4c   : > { %1668 = vrsqrt.f32 %v446_v53 }
  0x56   : > { %v1669_v54 = vpop.eup %1668 }
  0x57   : > { %v448_v55 = vmul.f32 %v1669_v54, %v428_v35  ;;  %v449_v56 = vmul.f32 %v1669_v54, %v429_v36  ;;  %v450_v57 = vmul.f32 %v1669_v54, %v430_v37  ;;  %v451_v58 = vmul.f32 %v1669_v54, %v431_v38  ;;  %v1975_v35 = vld [vmem:[%s2143_s4] sm:$0xff]  ;;  %v1983_v37 = vld [vmem:[%s2143_s4 + $0x10] sm:$0xff] }
  0x58   : > { %552 = vperm.xlu0 %1651, %v1975_v35  }
  0x59   : > { %v452_v59 = vpack.c.bf16 %v449_v56, %v448_v55  ;;  %v453_v60 = vpack.c.bf16 %v451_v58, %v450_v57 }
  0x5b   : > { %1518 = vmatprep.subr.bf16.mxu0 %v452_v59 }
  0x5c   : > { %1519 = vmatpush3.bf16.msra.mxu0 %v452_v59 }
  0x5d   : > { %1520 = vmatprep.subr.bf16.mxu0 %v453_v60 }
  0x60   : > { %1521 = vmatpush3.bf16.msra.mxu0 %v453_v60 }
  0x63   : > { %1523 = vmatmul.mubr.msk.bf16.vlgmr.msra.gmra.mrb[0].mxu0 %vm454_vm0, %v1658_v61 }
  0x64   : > { %1538 = vmatprep.mubr.msk.bf16.mxu0 %vm454_vm0, %v1663_v32 }
  0xab   : > { %v457_v5 = vpop.xlane.xlu0 %456 }
  0xac   : > { %v461_v6 = vmul.f32 0.03125, %v457_v5 }
  0xae   : > { %v1902_v7 = vsub.f32 %v1471_v1, %v461_v6 }
  0xaf   : > { %v460_v8 = vpop.xlane.xlu0 %459 }
  0xb0   : > { %v462_v9 = vmul.f32 0.03125, %v460_v8  ;;  %v465_v10 = vmul.f32 %v1902_v7, %v1902_v7 }
  0xb2   : > { %v1906_v11 = vsub.f32 %v1472_v2, %v462_v9  ;;  %v467_v12 = vsel %vm454_vm0, %v465_v10, 0.0  ;;  %v1482_v10 = vld [vmem:[%s395_s20 + $0x8] sm:$0xff]  }
  0xb3   : > { %468 = vadd.xlane.f32.xlu1 %v467_v12  ;;  %v1474_v12 = vld [vmem:[%s395_s20] sm:$0xff]   ;;  %s1460_s20 = sshll.u32 %s1770_s12, 9 }
  0xb4   : > { %v466_v13 = vmul.f32 %v1906_v11, %v1906_v11  ;;  %v1475_v15 = vunpack.c.l.bf16 %v1474_v12  ;;  %v1476_v16 = vunpack.c.h.bf16 %v1474_v12  ;;  %s2090_s12 = scalar_lea.hbm %s2148_s9, %s1460_s20 }
  0xb6   : > { %v470_v14 = vsel %vm454_vm0, %v466_v13, 0.0  ;;  %v1479_v13 = vunpack.c.l.bf16 %v1482_v10 }
  0xb7   : > { %471 = vadd.xlane.f32.xlu1 %v470_v14  ;;  %v1480_v14 = vunpack.c.h.bf16 %v1482_v10 }
  0xb8   : > { %v486_v17 = vsel %vm482_vm2, %v1479_v13, 0.0 }
  0xb9   : > { %v488_v19 = vsel %vm482_vm2, %v1480_v14, 0.0 }
  0xc8   : > { %557 = vperm.xlu1 %1652, %v1970_v33  }
  0xcc   : > { %562 = vperm.xlu1 %1652, %v1983_v37  }
  0xd0   : > { %567 = vperm.xlu1 %1652, %v1989_v43  }
 0x140   : > { %v469_v62 = vpop.xlane.xlu1 %468 }
 0x141   : > { %v473_v63 = vmul.f32 0.03125, %v469_v62 }
 0x143   : > { %v475_v0 = vadd.f32 1e-05, %v473_v63 }
 0x144   : > { %v472_v1 = vpop.xlane.xlu1 %471 }
 0x145   : > { %v474_v2 = vmul.f32 0.03125, %v472_v1  ;;  %1670 = vrsqrt.f32 %v475_v0 }
 0x147   : > { %v476_v3 = vadd.f32 1e-05, %v474_v2 }
 0x149   : > { %1672 = vrsqrt.f32 %v476_v3 }
 0x14f   : > { %v1671_v4 = vpop.eup %1670 }
 0x150   : > { %v479_v6 = vmul.f32 %v1671_v4, %v1902_v7  ;;  %v483_v7 = vsel %vm482_vm2, %v1475_v15, 0.0 }
 0x153   : > { %v1673_v5 = vpop.eup %1672 }
 0x154   : > { %v480_v8 = vmul.f32 %v1673_v5, %v1906_v11  ;;  %v484_v11 = vsel %vm482_vm2, %v1476_v16, 0.0 }
 0x155   : > { %v485_v18 = vadd.f32 %v484_v11, %v483_v7  ;;  %v1660_v7 = vld [vmem:[%s2144_s5 + $0x8] sm:$0xff]   ;;  %v1661_v11 = vld [vmem:[%s2144_s5 + $0x10] sm:$0xff]  }
 0x156   : > { %v481_v9 = vpack.c.bf16 %v480_v8, %v479_v6  ;;  %v1664_v6 = vld [vmem:[%s2142_s3 + $0x28] sm:$0xff]   ;;  %v1524_v8 = vpop.f32.mrb[0].mxu0 }
 0x157   : > { %v487_v23 = vadd.f32 %v486_v17, %v485_v18  ;;  %v1662_v18 = vld [vmem:[%s2144_s5 + $0x18] sm:$0xff]  }
 0x158   : > { %1531 = vmatmul.mubr.msk.bf16.vlgmr.msra.gmra.mrb[0].mxu1 %vm454_vm0, %v481_v9  ;;  %v620_v9 = vpop.f32.mrb[1].mxu0 }
 0x159   : > { %v489_v26 = vadd.f32 %v488_v19, %v487_v23  ;;  %1544 = vmatprep.mubr.msk.bf16.mxu1 %vm482_vm2, %v1659_v25  ;;  %v1525_v10 = vpop.f32.mrb[2].mxu0  ;;  %v558_v19 = vpop.permute.xlu1 %557 }
 0x15a   : > { %v623_v12 = vpop.f32.mrb[3].mxu0  ;;  %v553_v23 = vpop.permute.xlu0 %552 }
 0x15b   : > { %v490_v27 = vrot.slane %v489_v26, 4  ;;  %v624_v25 = vadd.f32 %v623_v12, %v558_v19  ;;  %v1124_v12 = vld [vmem:[%s2147_s8 + $0x10] sm:$0xff] }
 0x15d   : > { %v491_v28 = vadd.f32 %v490_v27, %v489_v26  ;;  %v621_v26 = vadd.f32 %v620_v9, %v553_v23  ;;  %v563_v27 = vpop.permute.xlu1 %562 }
 0x15f   : > { %v492_v29 = vrot.slane %v491_v28, 2 }
 0x161   : > { %v493_v30 = vadd.f32 %v492_v29, %v491_v28  ;;  %v882_v28 = vpack.c.bf16 %v624_v25, %v621_v26  ;;  %v629_v29 = vadd.f32 %v1524_v8, %v563_v27 }
 0x163   : > { %v494_v31 = vrot.slane %v493_v30, 1 }
 0x165   : > { %v495_v36 = vadd.f32 %v494_v31, %v493_v30  ;;  %v568_v30 = vpop.permute.xlu1 %567 }
 0x166   : > { %v632_v31 = vadd.f32 %v1525_v10, %v568_v30 }
 0x167   : > { %v496_v38 = vmul.f32 0.03125, %v495_v36 }
 0x168   : > { %v883_v32 = vpack.c.bf16 %v632_v31, %v629_v29 }
 0x169   : > { %v497_v39 = vsub.f32 %v1475_v15, %v496_v38  ;;  %v498_v40 = vsub.f32 %v1476_v16, %v496_v38  ;;  %v499_v41 = vsub.f32 %v1479_v13, %v496_v38  ;;  %v500_v42 = vsub.f32 %v1480_v14, %v496_v38 }
 0x16b   : > { %v501_v44 = vmul.f32 %v497_v39, %v497_v39  ;;  %v502_v45 = vmul.f32 %v498_v40, %v498_v40  ;;  %v503_v46 = vmul.f32 %v499_v41, %v499_v41  ;;  %v504_v47 = vmul.f32 %v500_v42, %v500_v42 }
 0x16d   : > { %v505_v48 = vsel %vm482_vm2, %v501_v44, 0.0  ;;  %v506_v49 = vsel %vm482_vm2, %v502_v45, 0.0  ;;  %v508_v50 = vsel %vm482_vm2, %v503_v46, 0.0  ;;  %v510_v52 = vsel %vm482_vm2, %v504_v47, 0.0  ;;  %v864_v45 = vld [vmem:[%s2145_s6 + $0x10] sm:$0xff]  ;;  %v865_v46 = vld [vmem:[%s2145_s6 + $0x18] sm:$0xff] }
 0x16e   : > { %v507_v51 = vadd.f32 %v506_v49, %v505_v48  ;;  %v862_v48 = vld [vmem:[%s2145_s6] sm:$0xff]  ;;  %v863_v49 = vld [vmem:[%s2145_s6 + $0x8] sm:$0xff] }
 0x170   : > { %v509_v53 = vadd.f32 %v508_v50, %v507_v51 }
 0x172   : > { %v511_v54 = vadd.f32 %v510_v52, %v509_v53 }
 0x174   : > { %v512_v55 = vrot.slane %v511_v54, 4 }
 0x176   : > { %v513_v56 = vadd.f32 %v512_v55, %v511_v54 }
 0x178   : > { %v514_v57 = vrot.slane %v513_v56, 2 }
 0x17a   : > { %v515_v58 = vadd.f32 %v514_v57, %v513_v56 }
 0x17c   : > { %v516_v59 = vrot.slane %v515_v58, 1 }
 0x17e   : > { %v517_v60 = vadd.f32 %v516_v59, %v515_v58  ;;  %v868_v59 = vld [vmem:[%s2145_s6 + $0x30] sm:$0xff] }
 0x180   : > { %v518_v61 = vmul.f32 0.03125, %v517_v60  ;;  %v869_v60 = vld [vmem:[%s2145_s6 + $0x38] sm:$0xff] }
 0x182   : > { %v519_v62 = vadd.f32 1e-05, %v518_v61 }
 0x184   : > { %1674 = vrsqrt.f32 %v519_v62  ;;  %v866_v62 = vld [vmem:[%s2145_s6 + $0x20] sm:$0xff] }
 0x18e   : > { %v1675_v63 = vpop.eup %1674 }
 0x18f   : > { %v521_v0 = vmul.f32 %v1675_v63, %v497_v39  ;;  %v522_v1 = vmul.f32 %v1675_v63, %v498_v40  ;;  %v523_v2 = vmul.f32 %v1675_v63, %v499_v41  ;;  %v524_v3 = vmul.f32 %v1675_v63, %v500_v42  ;;  %v867_v63 = vld [vmem:[%s2145_s6 + $0x28] sm:$0xff] }
 0x191   : > { %v525_v4 = vpack.c.bf16 %v522_v1, %v521_v0  ;;  %v526_v5 = vpack.c.bf16 %v524_v3, %v523_v2 }
 0x193   : > { %1534 = vmatprep.subr.bf16.mxu0 %v525_v4 }
 0x194   : > { %1535 = vmatpush3.bf16.msra.mxu0 %v525_v4 }
 0x195   : > { %1536 = vmatprep.subr.bf16.mxu0 %v526_v5 }
 0x198   : > { %1537 = vmatpush3.bf16.msra.mxu0 %v526_v5 }
 0x199   : > { %1552 = vmatprep.subr.bf16.mxu0 %v882_v28 }
 0x19b   : > { %1539 = vmatmul.mubr.msk.bf16.vlgmr.msra.gmra.mrb[4].mxu0 %vm454_vm0, %v1664_v6 }
 0x19c   : > { %1553 = vmatpush3.bf16.msra.mxu0 %v882_v28 }
 0x19d   : > { %1554 = vmatprep.subr.bf16.mxu0 %v883_v32 }
 0x1a0   : > { %1555 = vmatpush3.bf16.msra.mxu0 %v883_v32 }
 0x22b   : > { %v684_v13 = vpop.f32.mrb[0].mxu1 }
 0x22c   : > { %v1532_v14 = vpop.f32.mrb[1].mxu1 }
 0x22d   : > { %v687_v15 = vpop.f32.mrb[2].mxu1 }
 0x22e   : > { %v764_v16 = vpack.c.bf16 %v687_v15, %v684_v13  ;;  %v1533_v17 = vpop.f32.mrb[3].mxu1  ;;  %v1122_v13 = vld [vmem:[%s2147_s8] sm:$0xff] }
 0x22f   : > { %v1125_v17 = vld [vmem:[%s2147_s8 + $0x18] sm:$0xff] }
 0x230   : > { %1542 = vmatprep.subr.bf16.mxu1 %v764_v16 }
 0x231   : > { %1543 = vmatpush3.bf16.msra.mxu1 %v764_v16 }
 0x232   : > { %1564 = vmatprep.subr.bf16.mxu1 %v1665_v34 }
 0x234   : > { %1545 = vmatmul.mubr.msk.bf16.vlgmr.msra.gmra.mrb[4].mxu1 %vm482_vm2, %v1660_v7 }
 0x235   : > { %1548 = vmatprep.mubr.msk.bf16.mxu1 %vm482_vm2, %v1661_v11  ;;  %1565 = vmatpush3.bf16.msra.mxu1 %v1665_v34  ;;  %v1123_v11 = vld [vmem:[%s2147_s8 + $0x8] sm:$0xff] }
 0x23c   : > { %1549 = vmatmul.mubr.msk.bf16.gmra.mrb[8].mxu1 %vm482_vm2, %v1662_v18 }
 0x26e   : > { %v1540_v36 = vpop.f32.mrb[4].mxu0 }
 0x26f   : > { %v741_v38 = vpop.f32.mrb[5].mxu0 }
 0x270   : > { %v1541_v39 = vpop.f32.mrb[6].mxu0 }
 0x271   : > { %v1058_v40 = vpack.c.bf16 %v1541_v39, %v1540_v36  ;;  %v744_v41 = vpop.f32.mrb[7].mxu0 }
 0x272   : > { %v1057_v42 = vpack.c.bf16 %v744_v41, %v741_v38 }
 0x274   : > { %1566 = vmatprep.mubr.msk.bf16.mxu1 %vm482_vm2, %v1057_v42 }
 0x275   : > { %1567 = vmatmul.mubr.msk.bf16.vlgmr.msra.gmra.mrb[12].mxu1 %vm482_vm2, %v1058_v40 }
 0x307   : > { %v1546_v44 = vpop.f32.mrb[4].mxu1 }
 0x308   : > { %v831_v47 = vpop.f32.mrb[5].mxu1  ;;  %v872_v51 = vmul.f32 %v1546_v44, %v864_v45 }
 0x309   : > { %v1547_v50 = vpop.f32.mrb[6].mxu1  ;;  %v870_v54 = vmul.f32 %v862_v48, %v831_v47 }
 0x30a   : > { %v873_v52 = vmul.f32 %v1547_v50, %v865_v46  ;;  %v834_v53 = vpop.f32.mrb[7].mxu1 }
 0x30b   : > { %v871_v55 = vmul.f32 %v863_v49, %v834_v53 }
 0x30c   : > { %v879_v56 = vpack.c.bf16 %v873_v52, %v872_v51 }
 0x30d   : > { %v878_v57 = vpack.c.bf16 %v871_v55, %v870_v54 }
 0x30f   : > { %v1550_v58 = vpop.f32.mrb[8].mxu1  ;;  %1556 = vmatprep.mubr.msk.bf16.mxu0 %vm454_vm0, %v878_v57 }
 0x310   : > { %v847_v61 = vpop.f32.mrb[9].mxu1  ;;  %1557 = vmatmul.mubr.msk.bf16.vlgmr.msra.gmra.mrb[8].mxu0 %vm454_vm0, %v879_v56  ;;  %v876_v1 = vmul.f32 %v1550_v58, %v868_v59 }
 0x311   : > { %v1551_v0 = vpop.f32.mrb[10].mxu1  ;;  %v874_v4 = vmul.f32 %v866_v62, %v847_v61 }
 0x312   : > { %v877_v2 = vmul.f32 %v1551_v0, %v869_v60  ;;  %v850_v3 = vpop.f32.mrb[11].mxu1 }
 0x313   : > { %v875_v5 = vmul.f32 %v867_v63, %v850_v3 }
 0x314   : > { %v881_v6 = vpack.c.bf16 %v877_v2, %v876_v1 }
 0x315   : > { %v880_v8 = vpack.c.bf16 %v875_v5, %v874_v4 }
 0x317   : > { %1560 = vmatprep.mubr.msk.bf16.mxu0 %vm454_vm0, %v880_v8 }
 0x318   : > { %1561 = vmatmul.mubr.msk.bf16.gmra.mrb[12].mxu0 %vm454_vm0, %v881_v6 }
 0x348   : > { %v1568_v9 = vpop.f32.mrb[12].mxu1 }
 0x349   : > { %v1107_v10 = vpop.f32.mrb[13].mxu1  ;;  %v2051_v15 = vmul.f32 %v1568_v9, %v1124_v12 }
 0x34a   : > { %v1569_v14 = vpop.f32.mrb[14].mxu1  ;;  %v1126_v16 = vmul.f32 %v1122_v13, %v1107_v10 }
 0x34b   : > { %v1110_v7 = vpop.f32.mrb[15].mxu1  ;;  %v2059_v18 = vmul.f32 %v1569_v14, %v1125_v17 }
 0x34c   : > { %v1127_v19 = vmul.f32 %v1123_v11, %v1110_v7 }
 0x34d   : > { %v1131_v23 = vpack.c.bf16 %v2059_v18, %v2051_v15 }
 0x34e   : > { %v1130_v25 = vpack.c.bf16 %v1127_v19, %v1126_v16 }
 0x350   : > { %1578 = vmatprep.mubr.msk.bf16.mxu0 %vm1132_vm3, %v1130_v25 }
 0x3e3   : > { %v1558_v26 = vpop.f32.mrb[8].mxu0 }
 0x3e4   : > { %v930_v27 = vpop.f32.mrb[9].mxu0 }
 0x3e5   : > { %v1559_v28 = vpop.f32.mrb[10].mxu0 }
 0x3e6   : > { %v984_v29 = vmax.f32 %v1558_v26, %v1559_v28  ;;  %v933_v30 = vpop.f32.mrb[11].mxu0 }
 0x3e7   : > { %v961_v31 = vmax.f32 %v930_v27, %v933_v30 }
 0x3e8   : > { %v985_v32 = vrot.slane %v984_v29, 4 }
 0x3e9   : > { %v962_v34 = vrot.slane %v961_v31, 4 }
 0x3ea   : > { %v986_v36 = vmax.f32 %v984_v29, %v985_v32 }
 0x3eb   : > { %v963_v38 = vmax.f32 %v961_v31, %v962_v34  ;;  %v1562_v39 = vpop.f32.mrb[12].mxu0 }
 0x3ec   : > { %v987_v40 = vrot.slane %v986_v36, 2  ;;  %v946_v41 = vpop.f32.mrb[13].mxu0 }
 0x3ed   : > { %v964_v42 = vrot.slane %v963_v38, 2  ;;  %v1563_v44 = vpop.f32.mrb[14].mxu0 }
 0x3ee   : > { %v988_v45 = vmax.f32 %v986_v36, %v987_v40  ;;  %v1030_v46 = vmax.f32 %v1562_v39, %v1563_v44  ;;  %v949_v47 = vpop.f32.mrb[15].mxu0 }
 0x3ef   : > { %v965_v48 = vmax.f32 %v963_v38, %v964_v42  ;;  %v1007_v49 = vmax.f32 %v946_v41, %v949_v47 }
 0x3f0   : > { %v989_v50 = vrot.slane %v988_v45, 1  ;;  %v1031_v51 = vrot.slane %v1030_v46, 4 }
 0x3f1   : > { %v966_v52 = vrot.slane %v965_v48, 1  ;;  %v1008_v53 = vrot.slane %v1007_v49, 4 }
 0x3f2   : > { %v990_v54 = vmax.f32 %v988_v45, %v989_v50  ;;  %v1032_v55 = vmax.f32 %v1030_v46, %v1031_v51 }
 0x3f3   : > { %v967_v56 = vmax.f32 %v965_v48, %v966_v52  ;;  %v1009_v57 = vmax.f32 %v1007_v49, %v1008_v53 }
 0x3f4   : > { %v991_v58 = vsub.f32 %v1558_v26, %v990_v54  ;;  %v992_v59 = vsub.f32 %v1559_v28, %v990_v54  ;;  %v1033_v60 = vrot.slane %v1032_v55, 2 }
 0x3f5   : > { %v968_v61 = vsub.f32 %v930_v27, %v967_v56  ;;  %v969_v62 = vsub.f32 %v933_v30, %v967_v56  ;;  %v1010_v63 = vrot.slane %v1009_v57, 2 }
 0x3f6   : > { %v993_v0 = vmul.f32 1.442695, %v991_v58  ;;  %v995_v1 = vmul.f32 1.442695, %v992_v59  ;;  %v1034_v2 = vmax.f32 %v1032_v55, %v1033_v60 }
 0x3f7   : > { %v970_v3 = vmul.f32 1.442695, %v968_v61  ;;  %v972_v4 = vmul.f32 1.442695, %v969_v62  ;;  %v1011_v5 = vmax.f32 %v1009_v57, %v1010_v63 }
 0x3f8   : > { %1676 = vpow2.f32 %v993_v0  ;;  %v1035_v6 = vrot.slane %v1034_v2, 1 }
 0x3f9   : > { %1678 = vpow2.f32 %v995_v1  ;;  %v1012_v8 = vrot.slane %v1011_v5, 1 }
 0x3fa   : > { %1680 = vpow2.f32 %v970_v3  ;;  %v1036_v9 = vmax.f32 %v1034_v2, %v1035_v6 }
 0x3fb   : > { %1682 = vpow2.f32 %v972_v4  ;;  %v1013_v10 = vmax.f32 %v1011_v5, %v1012_v8 }
 0x3fc   : > { %v1037_v12 = vsub.f32 %v1562_v39, %v1036_v9  ;;  %v1038_v13 = vsub.f32 %v1563_v44, %v1036_v9 }
 0x3fd   : > { %v1014_v14 = vsub.f32 %v946_v41, %v1013_v10  ;;  %v1015_v16 = vsub.f32 %v949_v47, %v1013_v10 }
 0x3fe   : > { %v1039_v17 = vmul.f32 1.442695, %v1037_v12  ;;  %v1041_v7 = vmul.f32 1.442695, %v1038_v13 }
 0x3ff   : > { %v1016_v11 = vmul.f32 1.442695, %v1014_v14  ;;  %v1018_v19 = vmul.f32 1.442695, %v1015_v16 }
 0x400   : > { %1684 = vpow2.f32 %v1039_v17 }
 0x401   : > { %1686 = vpow2.f32 %v1041_v7 }
 0x402   : > { %v1677_v25 = vpop.eup %1676  ;;  %1688 = vpow2.f32 %v1016_v11 }
 0x403   : > { %v1679_v26 = vpop.eup %1678  ;;  %1690 = vpow2.f32 %v1018_v19  ;;  %v1666_v19 = vld [vmem:[%s2142_s3 + $0x30] sm:$0xff]  }
 0x404   : > { %v1681_v27 = vpop.eup %1680  ;;  %v997_v28 = vadd.f32 %v1679_v26, %v1677_v25  ;;  %1586 = vmatprep.mubr.msk.bf16.mxu1 %vm454_vm0, %v1666_v19 }
 0x405   : > { %v1683_v29 = vpop.eup %1682 }
 0x406   : > { %v998_v30 = vrot.slane %v997_v28, 4  ;;  %v974_v31 = vadd.f32 %v1683_v29, %v1681_v27 }
 0x408   : > { %v999_v32 = vadd.f32 %v998_v30, %v997_v28  ;;  %v975_v34 = vrot.slane %v974_v31, 4 }
 0x40a   : > { %v1685_v36 = vpop.eup %1684  ;;  %v1000_v38 = vrot.slane %v999_v32, 2  ;;  %v976_v39 = vadd.f32 %v975_v34, %v974_v31 }
 0x40b   : > { %v1687_v40 = vpop.eup %1686 }
 0x40c   : > { %v1689_v41 = vpop.eup %1688  ;;  %v1001_v42 = vadd.f32 %v1000_v38, %v999_v32  ;;  %v977_v44 = vrot.slane %v976_v39, 2  ;;  %v1043_v45 = vadd.f32 %v1687_v40, %v1685_v36 }
 0x40d   : > { %v1691_v46 = vpop.eup %1690 }
 0x40e   : > { %v978_v47 = vadd.f32 %v977_v44, %v976_v39  ;;  %v1044_v48 = vrot.slane %v1043_v45, 4  ;;  %v1020_v49 = vadd.f32 %v1691_v46, %v1689_v41  ;;  %v1002_v50 = vrot.slane %v1001_v42, 1 }
 0x410   : > { %v1045_v51 = vadd.f32 %v1044_v48, %v1043_v45  ;;  %v1021_v52 = vrot.slane %v1020_v49, 4  ;;  %v979_v53 = vrot.slane %v978_v47, 1  ;;  %v1003_v54 = vadd.f32 %v1002_v50, %v1001_v42 }
 0x412   : > { %v1046_v55 = vrot.slane %v1045_v51, 2  ;;  %v1022_v56 = vadd.f32 %v1021_v52, %v1020_v49  ;;  %v980_v57 = vadd.f32 %v979_v53, %v978_v47  ;;  %1692 = vrcp.f32 %v1003_v54 }
 0x414   : > { %v1047_v58 = vadd.f32 %v1046_v55, %v1045_v51  ;;  %v1023_v59 = vrot.slane %v1022_v56, 2  ;;  %1694 = vrcp.f32 %v980_v57 }
 0x416   : > { %v1024_v60 = vadd.f32 %v1023_v59, %v1022_v56  ;;  %v1048_v61 = vrot.slane %v1047_v58, 1 }
 0x418   : > { %v1025_v62 = vrot.slane %v1024_v60, 1  ;;  %v1049_v63 = vadd.f32 %v1048_v61, %v1047_v58 }
 0x41a   : > { %v1026_v0 = vadd.f32 %v1025_v62, %v1024_v60  ;;  %1696 = vrcp.f32 %v1049_v63 }
 0x41c   : > { %v1693_v1 = vpop.eup %1692  ;;  %1698 = vrcp.f32 %v1026_v0 }
 0x41d   : > { %v1005_v2 = vmul.f32 %v1693_v1, %v1677_v25  ;;  %v1006_v3 = vmul.f32 %v1693_v1, %v1679_v26  ;;  %v1783_v25 = vmov 1  }
 0x41e   : > { %v1695_v4 = vpop.eup %1694  ;;  %1653 = vset.pattern.permute.xlu1 %v1783_v25  ;;  %1654 = vset.pattern.permute.xlu0 %v1783_v25 }
 0x41f   : > { %v982_v5 = vmul.f32 %v1695_v4, %v1681_v27  ;;  %v983_v6 = vmul.f32 %v1695_v4, %v1683_v29  ;;  %v1054_v8 = vpack.c.bf16 %v1006_v3, %v1005_v2  ;;  %1191 = vperm.xlu1 %1653, %v1975_v35   ;;  %v1667_v35 = vld [vmem:[%s2142_s3 + $0x38] sm:$0xff]  }
 0x421   : > { %v1053_v9 = vpack.c.bf16 %v983_v6, %v982_v5 }
 0x423   : > { %1570 = vmatprep.subr.bf16.mxu0 %v1053_v9  ;;  %1195 = vperm.xlu1 %1653, %v1970_v33  }
 0x424   : > { %v1697_v10 = vpop.eup %1696  ;;  %1571 = vmatpush3.bf16.msra.mxu0 %v1053_v9 }
 0x425   : > { %1572 = vmatprep.subr.bf16.mxu0 %v1054_v8  ;;  %v1051_v12 = vmul.f32 %v1697_v10, %v1685_v36  ;;  %v1052_v13 = vmul.f32 %v1697_v10, %v1687_v40 }
 0x426   : > { %v1699_v14 = vpop.eup %1698 }
 0x427   : > { %v1028_v16 = vmul.f32 %v1699_v14, %v1689_v41  ;;  %v1029_v17 = vmul.f32 %v1699_v14, %v1691_v46  ;;  %v1056_v7 = vpack.c.bf16 %v1052_v13, %v1051_v12  ;;  %1199 = vperm.xlu1 %1653, %v1983_v37  }
 0x428   : > { %1573 = vmatpush3.bf16.msra.mxu0 %v1054_v8 }
 0x429   : > { %v1055_v11 = vpack.c.bf16 %v1029_v17, %v1028_v16 }
 0x42b   : > { %1574 = vmatprep.subr.bf16.mxu0 %v1055_v11  ;;  %1203 = vperm.xlu1 %1653, %v1989_v43  }
 0x42c   : > { %1575 = vmatpush3.bf16.msra.mxu0 %v1055_v11 }
 0x42d   : > { %1576 = vmatprep.subr.bf16.mxu0 %v1056_v7 }
 0x430   : > { %1577 = vmatpush3.bf16.msra.mxu0 %v1056_v7 }
 0x433   : > { %1579 = vmatmul.mubr.msk.bf16.vlgmr.msra.gmra.mrb[16].mxu0 %vm1132_vm3, %v1131_v23 }
 0x49e   : > { %v1192_v33 = vpop.permute.xlu1 %1191 }
 0x4a2   : > { %v1196_v37 = vpop.permute.xlu1 %1195 }
 0x4a6   : > { %v1200_v43 = vpop.permute.xlu1 %1199 }
 0x4aa   : > { %v1204_v32 = vpop.permute.xlu1 %1203 }
 0x506   : > { %v1580_v15 = vpop.f32.mrb[16].mxu0 }
 0x507   : > { %v1173_v18 = vpop.f32.mrb[17].mxu0 }
 0x508   : > { %v1581_v23 = vpop.f32.mrb[18].mxu0 }
 0x509   : > { %v1189_v26 = vpack.c.bf16 %v1581_v23, %v1580_v15  ;;  %v1176_v27 = vpop.f32.mrb[19].mxu0 }
 0x50a   : > { %v1188_v28 = vpack.c.bf16 %v1176_v27, %v1173_v18 }
 0x50c   : > { %1582 = vmatprep.subr.bf16.mxu1 %v1188_v28 }
 0x50d   : > { %1583 = vmatpush3.bf16.msra.mxu1 %v1188_v28 }
 0x50e   : > { %1584 = vmatprep.subr.bf16.mxu1 %v1189_v26 }
 0x511   : > { %1585 = vmatpush3.bf16.msra.mxu1 %v1189_v26 }
 0x514   : > { %1587 = vmatmul.mubr.msk.bf16.vlgmr.msra.gmra.mrb[16].mxu1 %vm454_vm0, %v1667_v35 }
 0x5e7   : > { %v1588_v29 = vpop.f32.mrb[16].mxu1 }
 0x5e8   : > { %v1265_v30 = vadd.f32 %v1588_v29, %v1200_v43  ;;  %v1256_v31 = vpop.f32.mrb[17].mxu1 }
 0x5e9   : > { %v1257_v34 = vadd.f32 %v1256_v31, %v1192_v33  ;;  %v1589_v36 = vpop.f32.mrb[18].mxu1 }
 0x5ea   : > { %v1273_v38 = vadd.f32 %v1924_v20, %v1265_v30  ;;  %v1268_v39 = vadd.f32 %v1589_v36, %v1204_v32  ;;  %v1259_v40 = vpop.f32.mrb[19].mxu1 }
 0x5eb   : > { %v1271_v41 = vadd.f32 %v1926_v21, %v1257_v34  ;;  %v1260_v42 = vadd.f32 %v1259_v40, %v1196_v37 }
 0x5ec   : > { %1277 = vst [vmem:[%s377_s15 + $0x10] sm:$0xff] %v1273_v38  ;;  %v1274_v44 = vadd.f32 %v1933_v24, %v1268_v39 }
 0x5ed   : > { %1275 = vst [vmem:[%s377_s15] sm:$0xff] %v1271_v41  ;;  %v1272_v20 = vadd.f32 %v1928_v22, %v1260_v42 }
 0x5ee   : > { %1278 = vst [vmem:[%s377_s15 + $0x18] sm:$0xff] %v1274_v44 }
 0x5ef   : > { %1276 = vst [vmem:[%s377_s15 + $0x8] sm:$0xff] %v1272_v20 }
 0x5f0   : > { %1713 = shalt.err (!%p1710_p5)
}
 0x5f1   : > { %s1714_s28 = scalar_lea.hbm %s2090_s12, 512  ;;  %s1718_s23 = scalar_lea.hbm %s2148_s9, 1024 }
 0x5f2   : > { %p1715_p6 = scmp.ne.s32.totalorder %s2090_s12, %s1714_s28  ;;  %p1719_p10 = scmp.lt.u32.totalorder %s2090_s12, %s2148_s9 }
 0x5f3   : > { %p1720_p11 = scmp.lt.u32.totalorder %s1718_s23, %s1714_s28  ;;  %p1722_p13 = scmp.lt.u32.totalorder %s1714_s28, %s2090_s12 }
 0x5f4   : > { %p1716_p7 = pnand %p1715_p6, %p1877_p4 }
 0x5f5   : > { %p1721_p12 = por %p1720_p11, %p1719_p10 }
 0x5f6   : > { %p1717_p9 = pneg %p1716_p7 }
 0x5f7   : > { %p1723_p0 = por %p1722_p13, %p1721_p12 }
 0x5f9   : > { %p1724_p1 = pnand %p1723_p0, %p1717_p9 }
 0x5fb   : > { %1727 = shalt.err (!%p1724_p1)
}
 0x5fc   : > { %s1785_s25 = smov 128   ;;  %s1786_s27 = smov 8  }
 0x5fd   : > { %1590 = dma.vmem_to_hbm [thread:$0]  (%p1877_p4), %s2084_s16, 512, %s2090_s12, %s2093_s18, %s1785_s25, %s1785_s25, %s1786_s27  }
 0x5fe PF: > { %p1596_p2 = scmp.ge.s32.totalorder %s1778_s14, 2  ;;  %s1309_s29 = sand.u32 1, %s1758_s30  }
 0x5ff   : > { %s1310_s28 = scalar_lea.sflag [#allocation3], %s1309_s29 }
 0x600   : > { %p1593_p3 = pnand %p1596_p2, %p1884_p8 }
 0x602   : > { %1753 = dma.done.wait (!%p1593_p3), %s1310_s28, 512  }
 0x603   : > { %1755 = vsyncadd (!%p1593_p3), %s1310_s28, 4294966784  ;;  %s22_s14 = sadd.s32 1, %s1778_s14   ;;  %s2151_s30 = smov %s1762_s10 }
 0x604   : > { %p19_p5 = scmp.ge.s32.totalorder %s22_s14, 4   ;;  %s2152_s10 = smov %s1766_s11 }
 0x605   : > { %s2153_s11 = smov %s1890_s22  ;;  %s2154_s12 = smov %s1774_s13 }
 0x606   : > { %s2155_s13 = smov %s2157_s17  ;;  %21 = sbr.rel (!%p19_p5) target bundleno = 4 (0x4), region = 100 }
 0x60d   :  { %1315 = vsyncpa [#allocation3], 1 }
 0x60e   :  { %1317 = vsyncpa [#allocation3 + $0x1], 1 }

</bundles_post_ra>
